<compile_context>
chip_gen: v7x
topology: tpu7x:2x2x1
jax: 0.10.0
libtpu: 0.0.40
codegen_flags: <defaults>
</compile_context>

<pallas_src>
import math

import jax
import jax.numpy as jnp
from jax.experimental import pallas as pl
from jax.experimental.pallas import tpu as pltpu


def _pe_add_kernel(x_ref, pe_ref, o_ref):
    # x_ref : (TS, TB, D) VMEM tile of x
    # pe_ref: (TS, 1, D)  VMEM tile of pe (already in x.dtype)
    # o_ref : (TS, TB, D) VMEM tile of the output
    # pe broadcasts over the batch dim (sublane-replicated, cheap on the VPU).
    o_ref[...] = x_ref[...] + pe_ref[...]


def make_positional_encoding(d_model, max_len=5000, dtype=jnp.float32):
    """Builds the (max_len, 1, d_model) PE buffer, same math as the PyTorch module.

    Build this ONCE at model init in the model dtype and reuse it; the forward
    wrapper does no per-call slicing or casting.
    """
    position = jnp.arange(0, max_len, dtype=jnp.float32)[:, None]            # (max_len, 1)
    div_term = jnp.exp(
        jnp.arange(0, d_model, 2, dtype=jnp.float32) * (-math.log(10000.0) / d_model)
    )                                                                         # (ceil(d/2),)
    angles = position * div_term                                              # (max_len, ceil(d/2))
    pe = jnp.zeros((max_len, d_model), dtype=jnp.float32)
    pe = pe.at[:, 0::2].set(jnp.sin(angles))
    # Guard odd d_model (the classic PyTorch recipe shape-mismatches there).
    pe = pe.at[:, 1::2].set(jnp.cos(angles)[:, : d_model // 2])
    return pe[:, None, :].astype(dtype)                                       # (max_len, 1, d_model)


def _choose_tiles(S, B, D, itemsize, target_block_bytes):
    """Pick (TS, TB).

    Full d_model stays on the lane axis. Prefer the FULL batch as the block's
    second-to-last dim (contiguous x/out DMA rows, no inner grid axis, no
    masked partial-batch stores); only split B for very large batches, in
    dtype sublane-packing multiples. TS is sized to hit the per-block byte
    target, kept 8-divisible when it doesn't cover all of S, and capped so a
    big problem still yields >= 4 S-tiles for v7x's two TensorCores.
    """
    # Sublane packing granularity for the second-to-last block dim:
    # 8 rows for 32-bit, 16 for 16-bit, 32 for 8-bit dtypes.
    packing = 8 * max(1, 4 // max(1, itemsize))

    if B <= packing or 8 * B * D * itemsize <= target_block_bytes:
        tb = B                                          # full batch, contiguous rows
    else:
        tb = (target_block_bytes // (8 * D * itemsize) // packing) * packing
        tb = min(max(tb, packing), B)

    row_bytes = max(1, tb * D * itemsize)               # bytes per sequence step in a block
    ts = max(1, target_block_bytes // row_bytes)
    if ts >= S:
        ts = S
    else:
        ts = max(8, (ts // 8) * 8)

    # Megacore: keep >= 4 S-tiles when the problem is big enough to matter.
    if S * row_bytes > (2 << 20):
        ts_cap = ((S // 4) // 8) * 8
        if ts_cap >= 8:
            ts = min(ts, ts_cap)

    return min(ts, S), tb


def positional_encoding_forward(x, pe, *, donate_x=False, target_block_bytes=6 << 20):
    """x: (S, B, D); pe: (max_len, 1, D) buffer in x.dtype. Returns x + pe[:S]."""
    S, B, D = x.shape
    assert pe.shape[0] >= S and pe.shape[1] == 1 and pe.shape[2] == D

    if pe.dtype != x.dtype:
        # Prefer building the table in the model dtype at init; this cast is a
        # fallback and costs an extra (un-hidden) XLA op per call.
        pe = pe.astype(x.dtype)

    itemsize = x.dtype.itemsize
    ts, tb = _choose_tiles(S, B, D, itemsize, target_block_bytes)

    cost = pl.CostEstimate(
        flops=S * B * D,
        transcendentals=0,
        bytes_accessed=(2 * S * B * D + S * D) * itemsize,
    )

    if tb == B:
        # Single grid axis over S: every x/out block row is a contiguous copy.
        grid = (pl.cdiv(S, ts),)
        in_specs = [
            pl.BlockSpec((ts, B, D), lambda s: (s, 0, 0)),
            pl.BlockSpec((ts, 1, D), lambda s: (s, 0, 0)),
        ]
        out_spec = pl.BlockSpec((ts, B, D), lambda s: (s, 0, 0))
        dims = ("parallel",)
    else:
        # Very large batch: split B in packing multiples; pe block index is
        # independent of b so its DMA is skipped while b iterates innermost.
        grid = (pl.cdiv(S, ts), pl.cdiv(B, tb))
        in_specs = [
            pl.BlockSpec((ts, tb, D), lambda s, b: (s, b, 0)),
            pl.BlockSpec((ts, 1, D), lambda s, b: (s, 0, 0)),
        ]
        out_spec = pl.BlockSpec((ts, tb, D), lambda s, b: (s, b, 0))
        dims = ("parallel", "parallel")

    return pl.pallas_call(
        _pe_add_kernel,
        out_shape=jax.ShapeDtypeStruct((S, B, D), x.dtype),
        grid_spec=pl.GridSpec(grid=grid, in_specs=in_specs, out_specs=out_spec),
        compiler_params=pltpu.CompilerParams(
            dimension_semantics=dims,
            # Double-buffered x + out + pe at ~6 MiB tiles ≈ 25 MiB; leave
            # headroom under v7x's 64 MiB per-TC VMEM (v5e/v6e have 128 MiB).
            vmem_limit_bytes=48 * 1024 * 1024,
        ),
        cost_estimate=cost,
        # Caller must not read x afterwards if donate_x=True.
        input_output_aliases=({0: 0} if donate_x else {}),
    )(x, pe)


if __name__ == "__main__":
    key = jax.random.PRNGKey(0)
    k1, k2, k3, k4 = jax.random.split(key, 4)

    # 1) Toy config from the original model: (seq, batch, d_model) = (8, 2, 32).
    S, B, D = 8, 2, 32
    x = jax.random.normal(k1, (S, B, D), dtype=jnp.float32)
    pe = make_positional_encoding(d_model=D, max_len=16, dtype=jnp.float32)
    ref = x + pe[:S]                                      # (S,1,D) broadcasts over batch
    out = jax.block_until_ready(positional_encoding_forward(x, pe))
    assert out.shape == (S, B, D)
    assert jnp.allclose(out, ref, atol=1e-6, rtol=1e-6)

    # 2) Layout-friendly shape: full-batch tiles, multiple S-tiles, pe reuse.
    S2, B2, D2 = 96, 12, 256
    x2 = jax.random.normal(k2, (S2, B2, D2), dtype=jnp.float32)
    pe2 = make_positional_encoding(d_model=D2, max_len=128, dtype=jnp.float32)
    ref2 = x2 + pe2[:S2]
    out2 = jax.block_until_ready(
        positional_encoding_forward(x2, pe2, target_block_bytes=64 * 1024)
    )
    assert jnp.allclose(out2, ref2, atol=1e-6, rtol=1e-6)

    # 3) Large-batch path: forces the batch split (packing multiples) branch.
    S3, B3, D3 = 32, 64, 128
    x3 = jax.random.normal(k3, (S3, B3, D3), dtype=jnp.float32)
    pe3 = make_positional_encoding(d_model=D3, max_len=64, dtype=jnp.float32)
    ref3 = x3 + pe3[:S3]
    out3 = jax.block_until_ready(
        positional_encoding_forward(x3, pe3, target_block_bytes=64 * 1024)
    )
    assert jnp.allclose(out3, ref3, atol=1e-6, rtol=1e-6)

    # 4) bf16 path: table built once in the model dtype (no per-call cast).
    #    NOTE: PyTorch would promote bf16 x + fp32 pe to fp32; we intentionally
    #    keep compute/output in x.dtype.
    S4, B4, D4 = 16, 8, 128
    x4 = jax.random.normal(k4, (S4, B4, D4), dtype=jnp.float32).astype(jnp.bfloat16)
    pe4 = make_positional_encoding(d_model=D4, max_len=32, dtype=jnp.bfloat16)
    ref4 = x4 + pe4[:S4]
    out4 = jax.block_until_ready(positional_encoding_forward(x4, pe4))
    assert jnp.allclose(out4.astype(jnp.float32), ref4.astype(jnp.float32),
                        atol=2e-2, rtol=2e-2)

    print("KERNEL_OK")
</pallas_src>

<mosaic_0001>
module attributes {stable_mosaic.version = 11 : i64} {
  func.func @_pe_add_kernel(%arg0: i32, %arg1: memref<8x2x32xf32, #tpu.memory_space<vmem>>, %arg2: memref<8x1x32xf32, #tpu.memory_space<vmem>>, %arg3: memref<8x2x32xf32, #tpu.memory_space<vmem>>) attributes {dimension_semantics = [#tpu.dimension_semantics<parallel>], iteration_bounds = array<i64: 1>, scalar_prefetch = 0 : i64, scratch_operands = 0 : i64, tpu.core_type = #tpu.core_type<tc>, window_params = [{transform_indices = @transform_0, window_bounds = array<i64: 8, 2, 32>}, {transform_indices = @transform_1, window_bounds = array<i64: 8, 1, 32>}, {transform_indices = @transform_2, window_bounds = array<i64: 8, 2, 32>}]} {
    %c0 = arith.constant 0 : index
    %c0_0 = arith.constant 0 : index
    %c0_1 = arith.constant 0 : index
    %0 = vector.load %arg1[%c0, %c0_0, %c0_1] : memref<8x2x32xf32, #tpu.memory_space<vmem>>, vector<8x2x32xf32>
    %c0_2 = arith.constant 0 : index
    %c0_3 = arith.constant 0 : index
    %c0_4 = arith.constant 0 : index
    %1 = vector.load %arg2[%c0_2, %c0_3, %c0_4] : memref<8x1x32xf32, #tpu.memory_space<vmem>>, vector<8x1x32xf32>
    %2 = vector.broadcast %1 : vector<8x1x32xf32> to vector<8x2x32xf32>
    %3 = arith.addf %0, %2 : vector<8x2x32xf32>
    %c0_5 = arith.constant 0 : index
    %c0_6 = arith.constant 0 : index
    %c0_7 = arith.constant 0 : index
    %4 = vector.load %arg3[%c0_5, %c0_6, %c0_7] : memref<8x2x32xf32, #tpu.memory_space<vmem>>, vector<8x2x32xf32>
    tpu.vector_store %arg3[%c0_5, %c0_6, %c0_7], %3 {strides = array<i32>} : memref<8x2x32xf32, #tpu.memory_space<vmem>>, vector<8x2x32xf32>,
    return
  }
  func.func @transform_0(%arg0: i32) -> (i32, i32, i32) {
    %c0_i32 = arith.constant 0 : i32
    %c0_i32_0 = arith.constant 0 : i32
    %c0_i32_1 = arith.constant 0 : i32
    return %arg0, %c0_i32, %c0_i32_0 : i32, i32, i32
  }
  func.func @transform_1(%arg0: i32) -> (i32, i32, i32) {
    %c0_i32 = arith.constant 0 : i32
    %c0_i32_0 = arith.constant 0 : i32
    %c0_i32_1 = arith.constant 0 : i32
    return %arg0, %c0_i32, %c0_i32_0 : i32, i32, i32
  }
  func.func @transform_2(%arg0: i32) -> (i32, i32, i32) {
    %c0_i32 = arith.constant 0 : i32
    %c0_i32_0 = arith.constant 0 : i32
    %c0_i32_1 = arith.constant 0 : i32
    return %arg0, %c0_i32, %c0_i32_0 : i32, i32, i32
  }
}

</mosaic_0001>

<bundles_post_ra>
// kernel: tpu_custom_call.1
= control target key start
LH: loop header
LB: loop body
LE: loop exit
PB: predicated region body
PF: predicated region fallthrough
CT: control target
= control target key end

     0   :  { %7 = vsyncpa [#allocation3], 0  ;;  %s304_s0 = inlined_call_operand.hbm [shape: f32[8,2,32], index: 0, kind: input, shape index: {}]   ;;  %s305_s1 = inlined_call_operand.hbm [shape: f32[16,1,32], index: 1, kind: input, shape index: {}]   ;;  %s306_s2 = inlined_call_operand.hbm [shape: f32[8,2,32], index: 2, kind: output, shape index: {}]  }
   0x1   :  { %8 = vsyncpa [#allocation6], 0 }
   0x2   :  { %9 = vsyncpa [#allocation4], 0  ;;  %s226_s9 = smov [#allocation2]   ;;  %s154_s13 = scalar_lea.hbm %s304_s0, 256 }
   0x3   :  { %s15_s10 = sshll.u32 %s226_s9, 4  ;;  %p155_p0 = scmp.ne.s32.totalorder %s304_s0, %s154_s13  ;;  %s16_s10 = int_to_ptr.vmem [resolvable:$true] %s15_s10 }
   0x4   :  { %p158_p1 = scmp.lt.u32.totalorder %s154_s13, %s304_s0 }
   0x6   :  { %p160_p2 = pnand %p158_p1, %p155_p0 }
   0x8   :  { %163 = shalt.err (!%p160_p2)
}
   0x9   :  { %s164_s18 = scalar_lea.vmem %s16_s10, 256  ;;  %p169_p4 = scmp.lt.s32.totalorder %s16_s10, %s16_s10 }
   0xa   :  { %p165_p3 = scmp.ne.s32.totalorder %s16_s10, %s164_s18  ;;  %p170_p5 = scmp.lt.s32.totalorder %s164_s18, %s164_s18 }
   0xc   :  { %p171_p6 = por %p170_p5, %p169_p4 }
   0xe   :  { %p172_p7 = pnand %p171_p6, %p165_p3 }
  0x10   :  { %175 = shalt.err (!%p172_p7)
}
  0x11   :  { %s227_s19 = smov 32   ;;  %s228_s20 = smov 2  }
  0x12   :  { %21 = dma.hbm_to_vmem [thread:$0]  %s304_s0, 256, %s16_s10, [#allocation3], %s227_s19, %s227_s19, %s228_s20  }
  0x13   :  { %s229_s23 = smov [#allocation5]   ;;  %s176_s27 = scalar_lea.hbm %s305_s1, 128 }
  0x14   :  { %s27_s24 = sshll.u32 %s229_s23, 4  ;;  %p177_p8 = scmp.ne.s32.totalorder %s305_s1, %s176_s27  ;;  %s28_s24 = int_to_ptr.vmem [resolvable:$true] %s27_s24 }
  0x15   :  { %s178_s4 = scalar_lea.hbm %s305_s1, 256  ;;  %p180_p10 = scmp.lt.u32.totalorder %s176_s27, %s305_s1 }
  0x16   :  { %p179_p9 = scmp.lt.u32.totalorder %s178_s4, %s176_s27 }
  0x18   :  { %p181_p11 = por %p180_p10, %p179_p9 }
  0x1a   :  { %p182_p12 = pnand %p181_p11, %p177_p8 }
  0x1c   :  { %185 = shalt.err (!%p182_p12)
}
  0x1d   :  { %s186_s0 = scalar_lea.vmem %s28_s24, 128  ;;  %p191_p0 = scmp.lt.s32.totalorder %s28_s24, %s28_s24 }
  0x1e   :  { %p187_p13 = scmp.ne.s32.totalorder %s28_s24, %s186_s0  ;;  %p192_p1 = scmp.lt.s32.totalorder %s186_s0, %s186_s0 }
  0x20   :  { %p193_p2 = por %p192_p1, %p191_p0 }
  0x22   :  { %p194_p3 = pnand %p193_p2, %p187_p13 }
  0x24   :  { %197 = shalt.err (!%p194_p3)
}
  0x25   :  { %s230_s7 = smov 16   ;;  %s231_s8 = smov 1  }
  0x26   :  { %33 = dma.hbm_to_vmem [thread:$0]  %s305_s1, 128, %s28_s24, [#allocation6], %s230_s7, %s230_s7, %s231_s8  }
  0x27   :  { %220 = dma.done.wait [#allocation3], 256  }
  0x28   :  { %221 = vsyncadd [#allocation3], 4294967040 }
  0x29   :  { %222 = dma.done.wait [#allocation6], 128  }
  0x2a   :  { %223 = vsyncadd [#allocation6], 4294967168  ;;  %vm112_vm0 = vcmask 254976   ;;  %s232_s11 = smov [#allocation7]   ;;  %v40_v0 = vld [vmem:[#allocation2] sm:$0x3] }
  0x2b   :  { %s278_s12 = sshll.u32 %s232_s11, 4  ;;  %v139_v1 = vld [vmem:[#allocation5] ss:$0 sm:$0xff]  ;;  %v41_v2 = vld [vmem:[#allocation2 + $0x2] sm:$0x3]  ;;  %s127_s12 = int_to_ptr.vmem [resolvable:$true] %s278_s12 }
  0x2c   :  { %v104_v3 = vadd.f32 %v139_v1, %v40_v0  ;;  %v140_v4 = vld [vmem:[#allocation5 + $0x1] ss:$0 sm:$0xff]  ;;  %v42_v5 = vld [vmem:[#allocation2 + $0x4] sm:$0x3]  ;;  %v141_v6 = vld [vmem:[#allocation5 + $0x2] ss:$0 sm:$0xff]  ;;  %p203_p5 = scmp.lt.s32.totalorder %s127_s12, %s127_s12 }
  0x2d   :  { %v105_v7 = vadd.f32 %v140_v4, %v41_v2  ;;  %v106_v8 = vadd.f32 %v141_v6, %v42_v5  ;;  %v43_v9 = vld [vmem:[#allocation2 + $0x6] sm:$0x3]  ;;  %v142_v10 = vld [vmem:[#allocation5 + $0x3] ss:$0 sm:$0xff]  ;;  %v44_v11 = vld [vmem:[#allocation2 + $0x8] sm:$0x3] }
  0x2e   :  { %113 = vst.msk [vmem:[#allocation7] sm:$0x3] %vm112_vm0, %v104_v3  ;;  %v107_v12 = vadd.f32 %v142_v10, %v43_v9  ;;  %v143_v13 = vld [vmem:[#allocation5 + $0x4] ss:$0 sm:$0xff]  ;;  %v45_v14 = vld [vmem:[#allocation2 + $0xa] sm:$0x3] }
  0x2f   :  { %v144_v15 = vld [vmem:[#allocation5 + $0x5] ss:$0 sm:$0xff]  ;;  %114 = vst.msk [vmem:[#allocation7 + $0x2] sm:$0x3] %vm112_vm0, %v105_v7  ;;  %115 = vst.msk [vmem:[#allocation7 + $0x4] sm:$0x3] %vm112_vm0, %v106_v8  ;;  %v108_v16 = vadd.f32 %v143_v13, %v44_v11 }
  0x30   :  { %v109_v17 = vadd.f32 %v144_v15, %v45_v14  ;;  %v46_v18 = vld [vmem:[#allocation2 + $0xc] sm:$0x3]  ;;  %v145_v19 = vld [vmem:[#allocation5 + $0x6] ss:$0 sm:$0xff]  ;;  %v47_v20 = vld [vmem:[#allocation2 + $0xe] sm:$0x3] }
  0x31   :  { %116 = vst.msk [vmem:[#allocation7 + $0x6] sm:$0x3] %vm112_vm0, %v107_v12  ;;  %v110_v21 = vadd.f32 %v145_v19, %v46_v18  ;;  %v146_v22 = vld [vmem:[#allocation5 + $0x7] ss:$0 sm:$0xff]  ;;  %117 = vst.msk [vmem:[#allocation7 + $0x8] sm:$0x3] %vm112_vm0, %v108_v16 }
  0x32   :  { %118 = vst.msk [vmem:[#allocation7 + $0xa] sm:$0x3] %vm112_vm0, %v109_v17  ;;  %v111_v23 = vadd.f32 %v146_v22, %v47_v20  ;;  %s198_s1 = scalar_lea.vmem %s127_s12, 256 }
  0x33   :  { %119 = vst.msk [vmem:[#allocation7 + $0xc] sm:$0x3] %vm112_vm0, %v110_v21  ;;  %p199_p4 = scmp.ne.s32.totalorder %s127_s12, %s198_s1  ;;  %p204_p6 = scmp.lt.s32.totalorder %s198_s1, %s198_s1 }
  0x34   :  { %120 = vst.msk [vmem:[#allocation7 + $0xe] sm:$0x3] %vm112_vm0, %v111_v23 }
  0x35   :  { %p205_p7 = por %p204_p6, %p203_p5 }
  0x37   :  { %p206_p8 = pnand %p205_p7, %p199_p4 }
  0x39   :  { %209 = shalt.err (!%p206_p8)
}
  0x3a   :  { %s210_s15 = scalar_lea.hbm %s306_s2, 256 }
  0x3b   :  { %p211_p9 = scmp.ne.s32.totalorder %s306_s2, %s210_s15  ;;  %p214_p10 = scmp.lt.u32.totalorder %s210_s15, %s306_s2 }
  0x3d   :  { %p216_p11 = pnand %p214_p10, %p211_p9 }
  0x3f   :  { %219 = shalt.err (!%p216_p11)
}
  0x40   :  { %132 = dma.vmem_to_hbm [thread:$0]  %s127_s12, 256, %s306_s2, [#allocation4], %s227_s19, %s227_s19, %s228_s20  }
  0x41   :  { %224 = dma.done.wait [#allocation4], 256  }
  0x42   :  { %225 = vsyncadd [#allocation4], 4294967040 }
  0x43   :  { %136 = vsyncpa [#allocation3], 1 }
  0x44   :  { %137 = vsyncpa [#allocation6], 1 }
  0x45   :  { %138 = vsyncpa [#allocation4], 1 }

</bundles_post_ra>
